<compile_context>
chip_gen: v7x
topology: tpu7x:2x2x1
jax: 0.10.0
libtpu: 0.0.40
codegen_flags: <defaults>
</compile_context>

<pallas_src>
import jax
import jax.numpy as jnp
from jax.experimental import pallas as pl
from jax.experimental.pallas import tpu as pltpu

_PAIR_TILE = 512  # pairwise (i,j) tile edge; ~4-6 live f32 tiles => a few MiB


def vqa_per_dataset_kernel(inv_scale_ref, rel_row_ref, map_ref, ali_ref,
                           y_row_ref, rel_col_ref, y_col_ref, out_ref):
    """Computes loss_d for one dataset (grid axis = dataset index)."""
    N = rel_row_ref.shape[-1]
    eps = 1e-8
    inv_pairs = 1.0 / float(N * (N - 1))

    m = map_ref[0]            # (1, N)  mapped_score[d]
    yrow = y_row_ref[0]       # (1, N)  y[d]
    a = ali_ref[0]            # (1, N)  aligned_score[d]
    rrow = rel_row_ref[0]     # (1, N)  relative_score[d]   (r[j] along lanes)
    rcol = rel_col_ref[0]     # (N, 1)  relative_score[d]   (r[i] along sublanes)
    ycol = y_col_ref[0]       # (N, 1)  y[d]
    inv_sc = inv_scale_ref[0]  # (1, 1)  1/scale[d]

    # ---- loss_a: (1 - pearson)/2 -------------------------------------------
    mc = m - jnp.mean(m, axis=1, keepdims=True)
    yc = yrow - jnp.mean(yrow, axis=1, keepdims=True)
    num = jnp.sum(mc * yc, axis=1, keepdims=True)          # (1, 1)
    sxx = jnp.sum(mc * mc, axis=1, keepdims=True)          # (1, 1)
    syy = jnp.sum(yc * yc, axis=1, keepdims=True)          # (1, 1)
    # 1/(sqrt(sxx)*sqrt(syy)) == rsqrt(sxx*syy): one EUP op.
    cos = num * jax.lax.rsqrt(jnp.maximum(sxx * syy, eps * eps))
    la = (1.0 - cos) * 0.5                                  # (1, 1)

    # ---- l1: mean(|aligned - y|) * (1/scale) -------------------------------
    l1 = jnp.mean(jnp.abs(a - yrow), axis=1, keepdims=True) * inv_sc  # (1, 1)

    # ---- loss_m: pairwise monotonicity, symmetric upper triangle, tiled ----
    tile = min(_PAIR_TILE, N)
    starts = list(range(0, N, tile))
    acc = jnp.zeros((1, 1), jnp.float32)
    for ii, i0 in enumerate(starts):
        ti = min(tile, N - i0)
        r_i = rcol[i0:i0 + ti, :]          # (ti, 1)
        y_i = ycol[i0:i0 + ti, :]          # (ti, 1)
        for j0 in starts[ii:]:             # only j-tiles with j >= i (symmetry)
            tj = min(tile, N - j0)
            r_j = rrow[:, j0:j0 + tj]      # (1, tj)
            y_j = yrow[:, j0:j0 + tj]      # (1, tj)
            # Implicit (ti,1) x (1,tj) broadcasting -- no broadcast_to buffers.
            dR = r_i - r_j                 # (ti, tj): r[i] - r[j]
            gt = y_j > y_i                 # y[j] > y[i]
            lt = y_j < y_i                 # y[j] < y[i]  (ties contribute 0)
            # relu((r_i - r_j) * sign(y_j - y_i)) fused into selects.
            pm = jnp.where(gt, jnp.maximum(dR, 0.0),
                           jnp.where(lt, jnp.maximum(-dR, 0.0), 0.0))
            if j0 == i0:
                # Diagonal tile: keep strict upper triangle only.
                col = jax.lax.broadcasted_iota(jnp.int32, (ti, tj), 1)
                row = jax.lax.broadcasted_iota(jnp.int32, (ti, tj), 0)
                pm = jnp.where(col > row, pm, 0.0)
            acc = acc + jnp.sum(jnp.sum(pm, axis=1, keepdims=True),
                                axis=0, keepdims=True)
    lm = acc * (2.0 * inv_pairs)           # 2 * strict-upper-sum / (N*(N-1))

    out_ref[0] = la + lm + l1              # (1, 1)


@jax.jit
def vqa_loss_mixed(scale, relative_score, mapped_score, aligned_score, y):
    D, N = y.shape
    f32 = jnp.float32

    # Hoisted out of the kernel: reciprocal of scale; the "column" views are
    # free reshapes (no transposes / extra HBM traffic).
    inv_scale = (1.0 / scale.astype(f32)).reshape(D, 1, 1)
    rel_row = relative_score.astype(f32).reshape(D, 1, N)
    map_row = mapped_score.astype(f32).reshape(D, 1, N)
    ali_row = aligned_score.astype(f32).reshape(D, 1, N)
    y_row = y.astype(f32).reshape(D, 1, N)
    rel_col = relative_score.astype(f32).reshape(D, N, 1)
    y_col = y.astype(f32).reshape(D, N, 1)

    row_spec = pl.BlockSpec((1, 1, N), lambda d: (d, 0, 0))
    col_spec = pl.BlockSpec((1, N, 1), lambda d: (d, 0, 0))
    one_spec = pl.BlockSpec((1, 1, 1), lambda d: (d, 0, 0))

    losses = pl.pallas_call(
        vqa_per_dataset_kernel,
        out_shape=jax.ShapeDtypeStruct((D, 1, 1), f32),
        grid=(D,),
        in_specs=[one_spec, row_spec, row_spec, row_spec, row_spec,
                  col_spec, col_spec],
        out_specs=one_spec,
        compiler_params=pltpu.CompilerParams(
            dimension_semantics=("parallel",),        # shards D across TCs (v7x)
            vmem_limit_bytes=32 * 1024 * 1024),
    )(inv_scale, rel_row, map_row, ali_row, y_row, rel_col, y_col)

    # Tiny exp-weighted combine over D datasets (couples datasets, so it lives
    # outside the parallel-sharded kernel).  Max-subtraction is exact.
    l = losses[:, 0, 0]                                # (D,)
    w = jnp.exp(l - jnp.max(l))
    return jnp.sum(w * l) / jnp.sum(w)


def ref_loss_mixed(scale, rel, mp, ali, y):
    """Pure-JAX reference mirroring the PyTorch VQALoss 'mixed' forward."""
    D, N = y.shape
    losses = []
    for d in range(D):
        yd, md, rd, ad = y[d], mp[d], rel[d], ali[d]
        mc = md - md.mean()
        yc = yd - yd.mean()
        cos = jnp.sum(mc * yc) / jnp.maximum(
            jnp.sqrt(jnp.sum(mc * mc)) * jnp.sqrt(jnp.sum(yc * yc)), 1e-8)
        la = (1.0 - cos) / 2.0
        pm = jnp.maximum((rd[:, None] - rd[None, :]) *
                         jnp.sign(yd[None, :] - yd[:, None]), 0.0)
        lm = jnp.sum(pm) / (N * (N - 1))
        l1 = jnp.mean(jnp.abs(ad - yd)) / scale[d, 0]
        losses.append(la + lm + l1)
    losses = jnp.stack(losses)
    w = jnp.exp(losses)
    return jnp.sum(w * losses) / jnp.sum(w)


if __name__ == "__main__":
    # D datasets, N samples per dataset (N > 1 required by loss_a / loss_m).
    D, N = 2, 16
    key = jax.random.PRNGKey(0)
    k1, k2, k3, k4 = jax.random.split(key, 4)

    y = jax.random.uniform(k1, (D, N), jnp.float32, 0.0, 5.0)
    relative_score = y + 0.3 * jax.random.normal(k2, (D, N), jnp.float32)
    mapped_score = y + 0.3 * jax.random.normal(k3, (D, N), jnp.float32)
    aligned_score = y + 0.3 * jax.random.normal(k4, (D, N), jnp.float32)

    # Deterministic "parameters" of the module constructor.
    scale = jnp.array([[5.0], [3.0]], jnp.float32)  # (D, 1)

    out = jax.block_until_ready(
        vqa_loss_mixed(scale, relative_score, mapped_score, aligned_score, y))
    ref = jax.block_until_ready(
        ref_loss_mixed(scale, relative_score, mapped_score, aligned_score, y))

    assert abs(float(out) - float(ref)) <= 1e-4 * (1.0 + abs(float(ref))), (
        float(out), float(ref))
    print("KERNEL_OK")
</pallas_src>

<mosaic_0001>
module attributes {stable_mosaic.version = 11 : i64} {
  func.func @vqa_per_dataset_kernel(%arg0: i32, %arg1: memref<1x1x1xf32, #tpu.memory_space<vmem>>, %arg2: memref<1x1x16xf32, #tpu.memory_space<vmem>>, %arg3: memref<1x1x16xf32, #tpu.memory_space<vmem>>, %arg4: memref<1x1x16xf32, #tpu.memory_space<vmem>>, %arg5: memref<1x1x16xf32, #tpu.memory_space<vmem>>, %arg6: memref<1x16x1xf32, #tpu.memory_space<vmem>>, %arg7: memref<1x16x1xf32, #tpu.memory_space<vmem>>, %arg8: memref<1x1x1xf32, #tpu.memory_space<vmem>>) attributes {dimension_semantics = [#tpu.dimension_semantics<parallel>], iteration_bounds = array<i64: 2>, scalar_prefetch = 0 : i64, scratch_operands = 0 : i64, tpu.core_type = #tpu.core_type<tc>, window_params = [{transform_indices = @transform_0, window_bounds = array<i64: 1, 1, 1>}, {transform_indices = @transform_1, window_bounds = array<i64: 1, 1, 16>}, {transform_indices = @transform_2, window_bounds = array<i64: 1, 1, 16>}, {transform_indices = @transform_3, window_bounds = array<i64: 1, 1, 16>}, {transform_indices = @transform_4, window_bounds = array<i64: 1, 1, 16>}, {transform_indices = @transform_5, window_bounds = array<i64: 1, 16, 1>}, {transform_indices = @transform_6, window_bounds = array<i64: 1, 16, 1>}, {transform_indices = @transform_7, window_bounds = array<i64: 1, 1, 1>}]} {
    %c0 = arith.constant 0 : index
    %c0_0 = arith.constant 0 : index
    %c0_1 = arith.constant 0 : index
    %0 = vector.load %arg3[%c0, %c0_0, %c0_1] : memref<1x1x16xf32, #tpu.memory_space<vmem>>, vector<1x1x16xf32>
    %1 = vector.shape_cast %0 : vector<1x1x16xf32> to vector<1x16xf32>
    %c0_2 = arith.constant 0 : index
    %c0_3 = arith.constant 0 : index
    %c0_4 = arith.constant 0 : index
    %2 = vector.load %arg5[%c0_2, %c0_3, %c0_4] : memref<1x1x16xf32, #tpu.memory_space<vmem>>, vector<1x1x16xf32>
    %3 = vector.shape_cast %2 : vector<1x1x16xf32> to vector<1x16xf32>
    %c0_5 = arith.constant 0 : index
    %c0_6 = arith.constant 0 : index
    %c0_7 = arith.constant 0 : index
    %4 = vector.load %arg4[%c0_5, %c0_6, %c0_7] : memref<1x1x16xf32, #tpu.memory_space<vmem>>, vector<1x1x16xf32>
    %5 = vector.shape_cast %4 : vector<1x1x16xf32> to vector<1x16xf32>
    %c0_8 = arith.constant 0 : index
    %c0_9 = arith.constant 0 : index
    %c0_10 = arith.constant 0 : index
    %6 = vector.load %arg2[%c0_8, %c0_9, %c0_10] : memref<1x1x16xf32, #tpu.memory_space<vmem>>, vector<1x1x16xf32>
    %7 = vector.shape_cast %6 : vector<1x1x16xf32> to vector<1x16xf32>
    %c0_11 = arith.constant 0 : index
    %c0_12 = arith.constant 0 : index
    %c0_13 = arith.constant 0 : index
    %8 = vector.load %arg6[%c0_11, %c0_12, %c0_13] : memref<1x16x1xf32, #tpu.memory_space<vmem>>, vector<1x16x1xf32>
    %9 = vector.shape_cast %8 : vector<1x16x1xf32> to vector<16x1xf32>
    %c0_14 = arith.constant 0 : index
    %c0_15 = arith.constant 0 : index
    %c0_16 = arith.constant 0 : index
    %10 = vector.load %arg7[%c0_14, %c0_15, %c0_16] : memref<1x16x1xf32, #tpu.memory_space<vmem>>, vector<1x16x1xf32>
    %11 = vector.shape_cast %10 : vector<1x16x1xf32> to vector<16x1xf32>
    %c0_17 = arith.constant 0 : index
    %c0_18 = arith.constant 0 : index
    %c0_19 = arith.constant 0 : index
    %12 = vector.load %arg1[%c0_17, %c0_18, %c0_19] : memref<1x1x1xf32, #tpu.memory_space<vmem>>, vector<1x1x1xf32>
    %13 = vector.shape_cast %12 : vector<1x1x1xf32> to vector<1x1xf32>
    %cst = arith.constant dense<0.000000e+00> : vector<1xf32>
    %14 = vector.multi_reduction <add>, %1, %cst [1] : vector<1x16xf32> to vector<1xf32>
    %15 = vector.shape_cast %14 : vector<1xf32> to vector<1x1xf32>
    %cst_20 = arith.constant 1.600000e+01 : f32
    %16 = vector.broadcast %cst_20 : f32 to vector<1x1xf32>
    %17 = arith.divf %15, %16 : vector<1x1xf32>
    %18 = vector.broadcast %17 : vector<1x1xf32> to vector<1x16xf32>
    %19 = arith.subf %1, %18 : vector<1x16xf32>
    %cst_21 = arith.constant dense<0.000000e+00> : vector<1xf32>
    %20 = vector.multi_reduction <add>, %3, %cst_21 [1] : vector<1x16xf32> to vector<1xf32>
    %21 = vector.shape_cast %20 : vector<1xf32> to vector<1x1xf32>
    %cst_22 = arith.constant 1.600000e+01 : f32
    %22 = vector.broadcast %cst_22 : f32 to vector<1x1xf32>
    %23 = arith.divf %21, %22 : vector<1x1xf32>
    %24 = vector.broadcast %23 : vector<1x1xf32> to vector<1x16xf32>
    %25 = arith.subf %3, %24 : vector<1x16xf32>
    %26 = arith.mulf %19, %25 : vector<1x16xf32>
    %cst_23 = arith.constant dense<0.000000e+00> : vector<1xf32>
    %27 = vector.multi_reduction <add>, %26, %cst_23 [1] : vector<1x16xf32> to vector<1xf32>
    %28 = vector.shape_cast %27 : vector<1xf32> to vector<1x1xf32>
    %29 = arith.mulf %19, %19 : vector<1x16xf32>
    %cst_24 = arith.constant dense<0.000000e+00> : vector<1xf32>
    %30 = vector.multi_reduction <add>, %29, %cst_24 [1] : vector<1x16xf32> to vector<1xf32>
    %31 = vector.shape_cast %30 : vector<1xf32> to vector<1x1xf32>
    %32 = arith.mulf %25, %25 : vector<1x16xf32>
    %cst_25 = arith.constant dense<0.000000e+00> : vector<1xf32>
    %33 = vector.multi_reduction <add>, %32, %cst_25 [1] : vector<1x16xf32> to vector<1xf32>
    %34 = vector.shape_cast %33 : vector<1xf32> to vector<1x1xf32>
    %35 = arith.mulf %31, %34 : vector<1x1xf32>
    %cst_26 = arith.constant 1.000000e-16 : f32
    %36 = vector.broadcast %cst_26 : f32 to vector<1x1xf32>
    %37 = arith.maximumf %35, %36 : vector<1x1xf32>
    %38 = math.rsqrt %37 : vector<1x1xf32>
    %39 = arith.mulf %28, %38 : vector<1x1xf32>
    %cst_27 = arith.constant 1.000000e+00 : f32
    %40 = vector.broadcast %cst_27 : f32 to vector<1x1xf32>
    %41 = arith.subf %40, %39 : vector<1x1xf32>
    %cst_28 = arith.constant 5.000000e-01 : f32
    %42 = vector.broadcast %cst_28 : f32 to vector<1x1xf32>
    %43 = arith.mulf %41, %42 : vector<1x1xf32>
    %44 = arith.subf %5, %3 : vector<1x16xf32>
    %45 = math.absf %44 : vector<1x16xf32>
    %cst_29 = arith.constant dense<0.000000e+00> : vector<1xf32>
    %46 = vector.multi_reduction <add>, %45, %cst_29 [1] : vector<1x16xf32> to vector<1xf32>
    %47 = vector.shape_cast %46 : vector<1xf32> to vector<1x1xf32>
    %cst_30 = arith.constant 1.600000e+01 : f32
    %48 = vector.broadcast %cst_30 : f32 to vector<1x1xf32>
    %49 = arith.divf %47, %48 : vector<1x1xf32>
    %50 = arith.mulf %49, %13 : vector<1x1xf32>
    %cst_31 = arith.constant 0.000000e+00 : f32
    %51 = vector.broadcast %cst_31 : f32 to vector<1x1xf32>
    %52 = vector.broadcast %9 : vector<16x1xf32> to vector<16x16xf32>
    %53 = vector.broadcast %7 : vector<1x16xf32> to vector<16x16xf32>
    %54 = arith.subf %52, %53 : vector<16x16xf32>
    %55 = vector.broadcast %3 : vector<1x16xf32> to vector<16x16xf32>
    %56 = vector.broadcast %11 : vector<16x1xf32> to vector<16x16xf32>
    %57 = arith.cmpf ogt, %55, %56 : vector<16x16xf32>
    %58 = vector.broadcast %3 : vector<1x16xf32> to vector<16x16xf32>
    %59 = vector.broadcast %11 : vector<16x1xf32> to vector<16x16xf32>
    %60 = arith.cmpf olt, %58, %59 : vector<16x16xf32>
    %cst_32 = arith.constant 0.000000e+00 : f32
    %61 = vector.broadcast %cst_32 : f32 to vector<16x16xf32>
    %62 = arith.maximumf %54, %61 : vector<16x16xf32>
    %cst_33 = arith.constant 0.000000e+00 : f32
    %63 = vector.broadcast %cst_33 : f32 to vector<16x16xf32>
    %64 = arith.subf %63, %54 : vector<16x16xf32>
    %cst_34 = arith.constant 0.000000e+00 : f32
    %65 = vector.broadcast %cst_34 : f32 to vector<16x16xf32>
    %66 = arith.maximumf %64, %65 : vector<16x16xf32>
    %cst_35 = arith.constant 0.000000e+00 : f32
    %67 = vector.broadcast %cst_35 : f32 to vector<16x16xf32>
    %68 = arith.select %60, %66, %67 : vector<16x16xi1>, vector<16x16xf32>
    %69 = arith.select %57, %62, %68 : vector<16x16xi1>, vector<16x16xf32>
    %70 = tpu.iota {dimensions = array<i32: 1>} : vector<16x16xi32>
    %71 = tpu.iota {dimensions = array<i32: 0>} : vector<16x16xi32>
    %72 = arith.cmpi sgt, %70, %71 : vector<16x16xi32>
    %cst_36 = arith.constant 0.000000e+00 : f32
    %73 = vector.broadcast %cst_36 : f32 to vector<16x16xf32>
    %74 = arith.select %72, %69, %73 : vector<16x16xi1>, vector<16x16xf32>
    %cst_37 = arith.constant dense<0.000000e+00> : vector<16xf32>
    %75 = vector.multi_reduction <add>, %74, %cst_37 [1] : vector<16x16xf32> to vector<16xf32>
    %76 = vector.shape_cast %75 : vector<16xf32> to vector<16x1xf32>
    %cst_38 = arith.constant dense<0.000000e+00> : vector<1xf32>
    %77 = vector.multi_reduction <add>, %76, %cst_38 [0] : vector<16x1xf32> to vector<1xf32>
    %78 = vector.shape_cast %77 : vector<1xf32> to vector<1x1xf32>
    %79 = arith.addf %51, %78 : vector<1x1xf32>
    %cst_39 = arith.constant 0.00833333377 : f32
    %80 = vector.broadcast %cst_39 : f32 to vector<1x1xf32>
    %81 = arith.mulf %79, %80 : vector<1x1xf32>
    %82 = arith.addf %43, %81 : vector<1x1xf32>
    %83 = arith.addf %82, %50 : vector<1x1xf32>
    %c0_40 = arith.constant 0 : index
    %c0_41 = arith.constant 0 : index
    %c0_42 = arith.constant 0 : index
    %84 = vector.load %arg8[%c0_40, %c0_41, %c0_42] : memref<1x1x1xf32, #tpu.memory_space<vmem>>, vector<1x1x1xf32>
    %85 = vector.shape_cast %84 : vector<1x1x1xf32> to vector<1x1xf32>
    %86 = vector.shape_cast %83 : vector<1x1xf32> to vector<1x1x1xf32>
    tpu.vector_store %arg8[%c0_40, %c0_41, %c0_42], %86 {strides = array<i32>} : memref<1x1x1xf32, #tpu.memory_space<vmem>>, vector<1x1x1xf32>,
    return
  }
  func.func @transform_0(%arg0: i32) -> (i32, i32, i32) {
    %c0_i32 = arith.constant 0 : i32
    %c0_i32_0 = arith.constant 0 : i32
    %c0_i32_1 = arith.constant 0 : i32
    return %arg0, %c0_i32, %c0_i32_0 : i32, i32, i32
  }
  func.func @transform_1(%arg0: i32) -> (i32, i32, i32) {
    %c0_i32 = arith.constant 0 : i32
    %c0_i32_0 = arith.constant 0 : i32
    %c0_i32_1 = arith.constant 0 : i32
    return %arg0, %c0_i32, %c0_i32_0 : i32, i32, i32
  }
  func.func @transform_2(%arg0: i32) -> (i32, i32, i32) {
    %c0_i32 = arith.constant 0 : i32
    %c0_i32_0 = arith.constant 0 : i32
    %c0_i32_1 = arith.constant 0 : i32
    return %arg0, %c0_i32, %c0_i32_0 : i32, i32, i32
  }
  func.func @transform_3(%arg0: i32) -> (i32, i32, i32) {
    %c0_i32 = arith.constant 0 : i32
    %c0_i32_0 = arith.constant 0 : i32
    %c0_i32_1 = arith.constant 0 : i32
    return %arg0, %c0_i32, %c0_i32_0 : i32, i32, i32
  }
  func.func @transform_4(%arg0: i32) -> (i32, i32, i32) {
    %c0_i32 = arith.constant 0 : i32
    %c0_i32_0 = arith.constant 0 : i32
    %c0_i32_1 = arith.constant 0 : i32
    return %arg0, %c0_i32, %c0_i32_0 : i32, i32, i32
  }
  func.func @transform_5(%arg0: i32) -> (i32, i32, i32) {
    %c0_i32 = arith.constant 0 : i32
    %c0_i32_0 = arith.constant 0 : i32
    %c0_i32_1 = arith.constant 0 : i32
    return %arg0, %c0_i32, %c0_i32_0 : i32, i32, i32
  }
  func.func @transform_6(%arg0: i32) -> (i32, i32, i32) {
    %c0_i32 = arith.constant 0 : i32
    %c0_i32_0 = arith.constant 0 : i32
    %c0_i32_1 = arith.constant 0 : i32
    return %arg0, %c0_i32, %c0_i32_0 : i32, i32, i32
  }
  func.func @transform_7(%arg0: i32) -> (i32, i32, i32) {
    %c0_i32 = arith.constant 0 : i32
    %c0_i32_0 = arith.constant 0 : i32
    %c0_i32_1 = arith.constant 0 : i32
    return %arg0, %c0_i32, %c0_i32_0 : i32, i32, i32
  }
}

</mosaic_0001>

<bundles_post_ra>
// kernel: vqa_loss_mixed.1
= control target key start
LH: loop header
LB: loop body
LE: loop exit
PB: predicated region body
PF: predicated region fallthrough
CT: control target
= control target key end

     0   :  { %s668_s24 = smov 0   ;;  %s724_s0 = inlined_call_operand.vmem [shape: f32[2,1,1], index: 0, kind: input, shape index: {}]   ;;  %s725_s1 = inlined_call_operand.vmem [shape: f32[2,1,16], index: 1, kind: input, shape index: {}]   ;;  %s726_s2 = inlined_call_operand.vmem [shape: f32[2,1,16], index: 2, kind: input, shape index: {}]   ;;  %s727_s3 = inlined_call_operand.vmem [shape: f32[2,1,16], index: 3, kind: input, shape index: {}]   ;;  %s728_s4 = inlined_call_operand.vmem [shape: f32[2,1,16], index: 4, kind: input, shape index: {}]   ;;  %s729_s5 = inlined_call_operand.vmem [shape: f32[2,16,1], index: 5, kind: input, shape index: {}]   ;;  %s730_s6 = inlined_call_operand.vmem [shape: f32[2,16,1], index: 6, kind: input, shape index: {}]   ;;  %s731_s7 = inlined_call_operand.vmem [shape: f32[2,1,1], index: 7, kind: output, shape index: {}]  }
   0x1 LB: > { %s592_s25 = sadd.s32 4294967295, %s625_s24   ;;  %p596_p0 = scmp.ge.s32.totalorder %s625_s24, 1  ;;  %s625_s24 = sphi %s668_s24, %s17_s24  }
   0x2   : > { %p287_p1 = scmp.lt.s32.totalorder %s625_s24, 3 }
   0x4   : > { %p288_p2 = pnand %p596_p0, %p287_p1 }
   0x5   : > { %p337_p3 = scmp.lt.s32.totalorder (!%p288_p2), %s592_s25, 1  ;;  %v627_v0 = vmov (!%p288_p2), 0   ;;  %vm374_vm0 = vcmask (!%p288_p2), 122880   ;;  %v430_v10 = vlaneseq (!%p288_p2)  ;;  %vm468_vm4 = vcmask (!%p288_p2), 130048  }
   0x6   : > { %291 = sbr.rel (%p288_p2) target bundleno = 339 (0x153), region = 48  ;;  %615 = vset.pattern.permute.xlu1 (!%p288_p2), %v627_v0  ;;  %616 = vset.pattern.permute.xlu0 (!%p288_p2), %v627_v0  ;;  %vm486_vm8 = vcmask (!%p288_p2), 0  }
   0x7   : > { %v431_v13 = vshrl.u32 (!%p288_p2), %v430_v10, 7  ;;  %v460_v25 = vand.u32 (!%p288_p2), 127, %v430_v10 }
   0x9   : > { %v432_v15 = vsub.s32 (!%p288_p2), 0, %v431_v13  ;;  %v463_v29 = vadd.s32 (!%p288_p2), 8, %v431_v13  ;;  %vm464_vm5 = vcmp.gt.s32.totalorder (!%p288_p2), %v460_v25, %v431_v13 }
   0xb   : > { %vm465_vm3 = vcmp.gt.s32.totalorder (!%p288_p2), %v460_v25, %v463_v29 }
   0xd   : > { %s733_s25 = smov (!%p337_p3, %s592_s25), 1 }
   0xe   : > { %s345_s28 = scalar_lea.vmem %s726_s2, %s733_s25  ;;  %s351_s8 = scalar_lea.vmem %s728_s4, %s733_s25 }
   0xf   : > { %v365_v1 = vld [vmem:[%s345_s28] sm:$0x1]  ;;  %s604_s9 = sshll.u32 %s733_s25, 4  ;;  %s342_s18 = scalar_lea.vmem %s725_s1, %s733_s25 }
  0x10   : > { %v686_v2 = vld [vmem:[%s351_s8] sm:$0x1]  ;;  %v375_v3 = vsel %vm374_vm0, %v365_v1, 0.0  ;;  %s356_s12 = scalar_lea.vmem %s729_s5, %s604_s9  ;;  %s361_s15 = scalar_lea.vmem %s730_s6, %s604_s9 }
  0x11   : > { %376 = vadd.xlane.f32.xlu0 %v375_v3  ;;  %v369_v4 = vld [vmem:[%s356_s12] sm:$0xff]  ;;  %v381_v5 = vsel %vm374_vm0, %v686_v2, 0.0  ;;  %v370_v6 = vld [vmem:[%s356_s12 + $0x8] sm:$0xff]  ;;  %v433_v17 = vrot.slane %v686_v2, %v432_v15  ;;  %s348_s21 = scalar_lea.vmem %s727_s3, %s733_s25  ;;  %s339_s26 = scalar_lea.vmem %s724_s0, %s733_s25 }
  0x12   : > { %413 = vperm.xlu1 %615, %v369_v4   ;;  %v372_v7 = vld [vmem:[%s361_s15 + $0x8] sm:$0xff]  ;;  %v371_v8 = vld [vmem:[%s361_s15] sm:$0xff]  ;;  %s364_s29 = scalar_lea.vmem %s731_s7, %s733_s25 }
  0x13   : > { %v601_v11 = vld [vmem:[%s342_s18] ss:$0 sm:$0xff] }
  0x14   : > { %v367_v36 = vld [vmem:[%s348_s21] sm:$0x1] }
  0x15   : > { %382 = vadd.xlane.f32.xlu0 %v381_v5  ;;  %v404_v42 = vsub.f32 %v367_v36, %v686_v2 }
  0x16   : > { %418 = vperm.xlu1 %615, %v370_v6   ;;  %v373_v6 = vld [vmem:[%s339_s26] sm:$0x1] }
  0x17   : > { %v405_v49 = vand.u32 2147483647, %v404_v42 }
  0x19   : > { %v406_v51 = vsel %vm374_vm0, %v405_v49, 0.0 }
  0x1a   : > { %442 = vperm.xlu1 %615, %v372_v7  }
  0x2b   : > { %437 = vperm.xlu0 %616, %v371_v8  }
  0x91   : > { %v414_v9 = vpop.permute.xlu1 %413 }
  0x92   : > { %v427_v23 = vsub.f32 %v414_v9, %v601_v11 }
  0x94   : > { %v451_v33 = vsub.f32 0.0, %v427_v23  ;;  %v449_v41 = vmax.f32 %v427_v23, 0.0 }
  0x95   : > { %v419_v12 = vpop.permute.xlu1 %418 }
  0x96   : > { %v428_v14 = vsub.f32 %v419_v12, %v601_v11  ;;  %v453_v38 = vmax.f32 %v451_v33, 0.0 }
  0x98   : > { %v452_v16 = vsub.f32 0.0, %v428_v14  ;;  %v450_v26 = vmax.f32 %v428_v14, 0.0 }
  0x99   : > { %v443_v19 = vpop.permute.xlu1 %442 }
  0x9a   : > { %v454_v21 = vmax.f32 %v452_v16, 0.0  ;;  %vm448_vm1 = vcmp.lt.f32.partialorder %v433_v17, %v443_v19  ;;  %vm446_vm2 = vcmp.gt.f32.partialorder %v433_v17, %v443_v19 }
  0x9c   : > { %v456_v30 = vsel %vm448_vm1, %v454_v21, 0.0 }
  0x9d   : > { %v458_v35 = vsel %vm446_vm2, %v450_v26, %v456_v30 }
  0x9e   : > { %v377_v18 = vpop.xlane.xlu0 %376  ;;  %v467_v40 = vsel %vm465_vm3, %v458_v35, 0.0 }
  0x9f   : > { %v379_v20 = vmul.f32 0.0625, %v377_v18  ;;  %v472_v44 = vsel %vm468_vm4, %v467_v40, 0.0 }
  0xa1   : > { %v380_v22 = vsub.f32 %v365_v1, %v379_v20 }
  0xa2   : > { %v383_v24 = vpop.xlane.xlu0 %382 }
  0xa3   : > { %v384_v27 = vmul.f32 0.0625, %v383_v24  ;;  %v390_v28 = vmul.f32 %v380_v22, %v380_v22 }
  0xa5   : > { %v385_v31 = vsub.f32 %v686_v2, %v384_v27  ;;  %v391_v32 = vsel %vm374_vm0, %v390_v28, 0.0 }
  0xa6   : > { %392 = vadd.xlane.f32.xlu1 %v391_v32 }
  0xa7   : > { %v394_v34 = vmul.f32 %v385_v31, %v385_v31  ;;  %v386_v46 = vmul.f32 %v385_v31, %v380_v22 }
  0xa9   : > { %v395_v37 = vsel %vm374_vm0, %v394_v34, 0.0  ;;  %v387_v50 = vsel %vm374_vm0, %v386_v46, 0.0 }
  0xaa   : > { %396 = vadd.xlane.f32.xlu1 %v395_v37  ;;  %v438_v39 = vpop.permute.xlu0 %437 }
  0xab   : > { %vm445_vm6 = vcmp.gt.f32.partialorder %v433_v17, %v438_v39  ;;  %vm447_vm7 = vcmp.lt.f32.partialorder %v433_v17, %v438_v39 }
  0xac   : > { %v455_v43 = vsel %vm447_vm7, %v453_v38, 0.0 }
  0xad   : > { %v457_v45 = vsel %vm445_vm6, %v449_v41, %v455_v43 }
  0xae   : > { %473 = vadd.xlane.f32.xlu1 %v472_v44  ;;  %v466_v47 = vsel %vm464_vm5, %v457_v45, 0.0 }
  0xaf   : > { %v469_v48 = vsel %vm468_vm4, %v466_v47, 0.0 }
  0xb0   : > { %470 = vadd.xlane.f32.xlu0 %v469_v48 }
  0xb2   : > { %388 = vadd.xlane.f32.xlu1 %v387_v50 }
  0xb6   : > { %407 = vadd.xlane.f32.xlu1 %v406_v51 }
 0x133   : > { %v393_v52 = vpop.xlane.xlu1 %392 }
 0x137   : > { %v397_v53 = vpop.xlane.xlu1 %396 }
 0x138   : > { %v398_v54 = vmul.f32 %v397_v53, %v393_v52 }
 0x13a   : > { %v399_v55 = vmax.f32 %v398_v54, 1e-16 }
 0x13b   : > { %v474_v56 = vpop.xlane.xlu1 %473 }
 0x13c   : > { %617 = vrsqrt.f32 %v399_v55 }
 0x13d   : > { %v471_v57 = vpop.xlane.xlu0 %470 }
 0x13e   : > { %v475_v58 = vadd.f32 %v474_v56, %v471_v57 }
 0x13f   : > { %v389_v60 = vpop.xlane.xlu1 %388 }
 0x140   : > { %v476_v59 = vrot.slane %v475_v58, 4 }
 0x142   : > { %v477_v61 = vadd.f32 %v476_v59, %v475_v58 }
 0x143   : > { %v408_v63 = vpop.xlane.xlu1 %407 }
 0x144   : > { %v478_v62 = vrot.slane %v477_v61, 2  ;;  %v409_v4 = vmul.f32 0.0625, %v408_v63 }
 0x146   : > { %v618_v0 = vpop.eup %617  ;;  %v479_v1 = vadd.f32 %v478_v62, %v477_v61  ;;  %v410_v10 = vmul.f32 %v409_v4, %v373_v6 }
 0x147   : > { %v401_v2 = vmul.f32 %v618_v0, %v389_v60 }
 0x148   : > { %v480_v3 = vrot.slane %v479_v1, 1 }
 0x149   : > { %v402_v5 = vsub.f32 1.0, %v401_v2 }
 0x14a   : > { %v481_v7 = vadd.f32 %v480_v3, %v479_v1 }
 0x14b   : > { %v403_v8 = vmul.f32 0.5, %v402_v5 }
 0x14c   : > { %v483_v9 = vmul.f32 0.008333334, %v481_v7 }
 0x14e   : > { %v484_v11 = vadd.f32 %v483_v9, %v403_v8 }
 0x150   : > { %v485_v12 = vadd.f32 %v484_v11, %v410_v10 }
 0x152   : > { %487 = vst.msk [vmem:[%s364_s29] sm:$0x1] %vm486_vm8, %v485_v12 }
 0x153 PF: > { %s17_s24 = sadd.s32 1, %s625_s24  }
 0x154   : > { %p14_p4 = scmp.ge.s32.totalorder %s17_s24, 4  }
 0x156   :  { %16 = sbr.rel (!%p14_p4) target bundleno = 1 (0x1), region = 96 }

</bundles_post_ra>
